<compile_context>
chip_gen: v6e
topology: v6e:2x2x1
jax: 0.10.0
libtpu: 0.0.40
codegen_flags: <defaults>
</compile_context>

<pallas_src>
import jax
import jax.numpy as jnp
import numpy as np
from jax.experimental import pallas as pl
from jax.experimental.pallas import tpu as pltpu


def _timestep_embed_kernel(ts_ref, pe_ref, w1_ref, b1_ref, w2_ref, b2_ref, o_ref):
    # ts_ref : VMEM int32 [bs, 1]       (clamped timesteps)
    # pe_ref : VMEM bf16  [max_len, D]  (sinusoidal PE table)
    # w1/w2  : VMEM bf16  [D, D]        (input-major: y = x @ W + b)
    # b1/b2  : VMEM f32   [1, D]
    # o_ref  : VMEM f32   [1, bs, D]    (final layout, no post-kernel permute)
    bs = ts_ref.shape[0]
    max_len = pe_ref.shape[0]

    # Vectorized gather: one-hot [bs, max_len] (bf16) @ pe [max_len, D] on the MXU.
    ts = ts_ref[...]                                                  # [bs, 1] int32
    iota = jax.lax.broadcasted_iota(jnp.int32, (bs, max_len), 1)      # [bs, max_len]
    onehot = (iota == ts).astype(jnp.bfloat16)
    # Exactly reproduces pe_bf16[timesteps]: one nonzero term per row, 1.0 * bf16 value.
    x = jnp.dot(onehot, pe_ref[...],
                preferred_element_type=jnp.float32).astype(jnp.bfloat16)   # [bs, D] bf16

    # Linear -> SiLU -> Linear.  bf16 MXU operands, f32 accumulate / activation math.
    h = jnp.dot(x, w1_ref[...], preferred_element_type=jnp.float32) + b1_ref[...]
    h = h * jax.nn.sigmoid(h)                                         # SiLU in f32
    y = jnp.dot(h.astype(jnp.bfloat16), w2_ref[...],
                preferred_element_type=jnp.float32) + b2_ref[...]

    o_ref[0, :, :] = y.astype(o_ref.dtype)


def timestep_embedder_forward(timesteps, pe, w1, b1, w2, b2):
    """Full forward pass of TimestepEmbedder.

    timesteps: int32 [bs]
    pe:        float32 [max_len, 1, D]  (module buffer layout)
    w1, w2:    bfloat16 [D, D]  (input-major; transpose PyTorch nn.Linear weights)
    b1, b2:    float32 [1, D]
    returns:   float32 [1, bs, D]   (== .permute(1, 0, 2) of [bs, 1, D])
    """
    bs = timesteps.shape[0]
    max_len, d = pe.shape[0], pe.shape[-1]
    pe2d = pe.reshape(max_len, d).astype(jnp.bfloat16)     # bf16 table, half the DMA
    ts2d = jnp.clip(timesteps.astype(jnp.int32), 0, max_len - 1).reshape(bs, 1)

    vmem = pl.BlockSpec(memory_space=pltpu.MemorySpace.VMEM)
    return pl.pallas_call(
        _timestep_embed_kernel,
        out_shape=jax.ShapeDtypeStruct((1, bs, d), jnp.float32),
        in_specs=[vmem, vmem, vmem, vmem, vmem, vmem],
        out_specs=vmem,
    )(ts2d, pe2d, w1, b1, w2, b2)


def make_positional_encoding(max_len, d_model):
    """Standard sinusoidal PE table, shape [max_len, 1, d_model] (matches MDM's buffer)."""
    position = np.arange(max_len)[:, None].astype(np.float32)
    div_term = np.exp(np.arange(0, d_model, 2).astype(np.float32)
                      * (-np.log(10000.0) / d_model))
    pe = np.zeros((max_len, d_model), dtype=np.float32)
    pe[:, 0::2] = np.sin(position * div_term)
    pe[:, 1::2] = np.cos(position * div_term)
    return jnp.asarray(pe[:, None, :])  # [max_len, 1, d_model]


if __name__ == "__main__":
    latent_dim = 128      # D = time_embed_dim = latent_dim
    max_len = 64          # PE table length
    bs = 8                # number of timesteps (batch)

    key = jax.random.PRNGKey(0)
    k1, k2, k3, k4, k5 = jax.random.split(key, 5)

    # Deterministic synthetic parameters for the two Linear layers.
    # Stored input-major ([in, out]) so the kernel does x @ W + b.
    # TODO(synk): real PyTorch nn.Linear checkpoints store [out, in]; transpose when porting.
    scale = 1.0 / np.sqrt(latent_dim)
    w1_f32 = jax.random.uniform(k1, (latent_dim, latent_dim), jnp.float32, -scale, scale)
    b1 = jax.random.uniform(k2, (1, latent_dim), jnp.float32, -scale, scale)
    w2_f32 = jax.random.uniform(k3, (latent_dim, latent_dim), jnp.float32, -scale, scale)
    b2 = jax.random.uniform(k4, (1, latent_dim), jnp.float32, -scale, scale)
    w1 = w1_f32.astype(jnp.bfloat16)   # MXU operands stored bf16
    w2 = w2_f32.astype(jnp.bfloat16)

    pe = make_positional_encoding(max_len, latent_dim)
    timesteps = jax.random.randint(k5, (bs,), 0, max_len, dtype=jnp.int32)

    out = timestep_embedder_forward(timesteps, pe, w1, b1, w2, b2)
    out = jax.block_until_ready(out)
    assert out.shape == (1, bs, latent_dim), out.shape

    # Reference 1: pure-JAX with identical bf16 gather + bf16 matmul inputs (tight tolerance).
    pe2d_bf16 = pe.reshape(max_len, latent_dim).astype(jnp.bfloat16)
    x_g = pe2d_bf16[jnp.clip(timesteps, 0, max_len - 1)]             # [bs, D] bf16
    h_r = jnp.dot(x_g, w1, preferred_element_type=jnp.float32) + b1
    h_r = h_r * jax.nn.sigmoid(h_r)
    y_r = jnp.dot(h_r.astype(jnp.bfloat16), w2,
                  preferred_element_type=jnp.float32) + b2
    y_r = y_r.reshape(1, bs, latent_dim)
    np.testing.assert_allclose(np.asarray(out), np.asarray(y_r), rtol=1e-4, atol=1e-4)

    # Reference 2: full-f32 math (semantic sanity check vs the PyTorch module, bf16 tolerance).
    x_f = pe.reshape(max_len, latent_dim)[timesteps]
    h_f = x_f @ w1_f32 + b1
    h_f = h_f * jax.nn.sigmoid(h_f)
    y_f = (h_f @ w2_f32 + b2).reshape(1, bs, latent_dim)
    np.testing.assert_allclose(np.asarray(out), np.asarray(y_f), rtol=5e-2, atol=5e-2)

    print("KERNEL_OK")
</pallas_src>

<mosaic_0001>
module attributes {stable_mosaic.version = 11 : i64} {
  func.func @_timestep_embed_kernel(%arg0: memref<8x1xi32, #tpu.memory_space<vmem>>, %arg1: memref<64x128xbf16, #tpu.memory_space<vmem>>, %arg2: memref<128x128xbf16, #tpu.memory_space<vmem>>, %arg3: memref<1x128xf32, #tpu.memory_space<vmem>>, %arg4: memref<128x128xbf16, #tpu.memory_space<vmem>>, %arg5: memref<1x128xf32, #tpu.memory_space<vmem>>, %arg6: memref<1x8x128xf32, #tpu.memory_space<vmem>>) attributes {dimension_semantics = [], scalar_prefetch = 0 : i64, scratch_operands = 0 : i64, tpu.core_type = #tpu.core_type<tc>} {
    %c0 = arith.constant 0 : index
    %c0_0 = arith.constant 0 : index
    %0 = vector.load %arg0[%c0, %c0_0] : memref<8x1xi32, #tpu.memory_space<vmem>>, vector<8x1xi32>
    %1 = tpu.iota {dimensions = array<i32: 1>} : vector<8x64xi32>
    %2 = vector.broadcast %0 : vector<8x1xi32> to vector<8x64xi32>
    %3 = arith.cmpi eq, %1, %2 : vector<8x64xi32>
    %4 = arith.extui %3 : vector<8x64xi1> to vector<8x64xi32>
    %5 = arith.sitofp %4 : vector<8x64xi32> to vector<8x64xf32>
    %6 = arith.truncf %5 : vector<8x64xf32> to vector<8x64xbf16>
    %c0_1 = arith.constant 0 : index
    %c0_2 = arith.constant 0 : index
    %7 = vector.load %arg1[%c0_1, %c0_2] : memref<64x128xbf16, #tpu.memory_space<vmem>>, vector<64x128xbf16>
    %cst = arith.constant dense<0.000000e+00> : vector<8x128xf32>
    %8 = tpu.matmul %6, %7, %cst {dimension_numbers = #tpu.dot_dimension_numbers<[1], [0], [0], [1], [0, 0, 1, 1], [], []>} : vector<8x64xbf16>, vector<64x128xbf16>, vector<8x128xf32> -> vector<8x128xf32>
    %9 = arith.truncf %8 : vector<8x128xf32> to vector<8x128xbf16>
    %c0_3 = arith.constant 0 : index
    %c0_4 = arith.constant 0 : index
    %10 = vector.load %arg2[%c0_3, %c0_4] : memref<128x128xbf16, #tpu.memory_space<vmem>>, vector<128x128xbf16>
    %cst_5 = arith.constant dense<0.000000e+00> : vector<8x128xf32>
    %11 = tpu.matmul %9, %10, %cst_5 {dimension_numbers = #tpu.dot_dimension_numbers<[1], [0], [0], [1], [0, 0, 1, 1], [], []>} : vector<8x128xbf16>, vector<128x128xbf16>, vector<8x128xf32> -> vector<8x128xf32>
    %c0_6 = arith.constant 0 : index
    %c0_7 = arith.constant 0 : index
    %12 = vector.load %arg3[%c0_6, %c0_7] : memref<1x128xf32, #tpu.memory_space<vmem>>, vector<1x128xf32>
    %13 = vector.broadcast %12 : vector<1x128xf32> to vector<8x128xf32>
    %14 = arith.addf %11, %13 : vector<8x128xf32>
    %15 = arith.negf %14 : vector<8x128xf32>
    %16 = math.exp %15 : vector<8x128xf32>
    %cst_8 = arith.constant 1.000000e+00 : f32
    %17 = vector.broadcast %cst_8 : f32 to vector<8x128xf32>
    %18 = arith.addf %17, %16 : vector<8x128xf32>
    %19 = arith.divf %17, %18 : vector<8x128xf32>
    %20 = arith.mulf %14, %19 : vector<8x128xf32>
    %21 = arith.truncf %20 : vector<8x128xf32> to vector<8x128xbf16>
    %c0_9 = arith.constant 0 : index
    %c0_10 = arith.constant 0 : index
    %22 = vector.load %arg4[%c0_9, %c0_10] : memref<128x128xbf16, #tpu.memory_space<vmem>>, vector<128x128xbf16>
    %cst_11 = arith.constant dense<0.000000e+00> : vector<8x128xf32>
    %23 = tpu.matmul %21, %22, %cst_11 {dimension_numbers = #tpu.dot_dimension_numbers<[1], [0], [0], [1], [0, 0, 1, 1], [], []>} : vector<8x128xbf16>, vector<128x128xbf16>, vector<8x128xf32> -> vector<8x128xf32>
    %c0_12 = arith.constant 0 : index
    %c0_13 = arith.constant 0 : index
    %24 = vector.load %arg5[%c0_12, %c0_13] : memref<1x128xf32, #tpu.memory_space<vmem>>, vector<1x128xf32>
    %25 = vector.broadcast %24 : vector<1x128xf32> to vector<8x128xf32>
    %26 = arith.addf %23, %25 : vector<8x128xf32>
    %c0_14 = arith.constant 0 : index
    %c0_15 = arith.constant 0 : index
    %c0_16 = arith.constant 0 : index
    %27 = vector.load %arg6[%c0_14, %c0_15, %c0_16] : memref<1x8x128xf32, #tpu.memory_space<vmem>>, vector<1x8x128xf32>
    %28 = vector.shape_cast %27 : vector<1x8x128xf32> to vector<8x128xf32>
    %29 = vector.shape_cast %26 : vector<8x128xf32> to vector<1x8x128xf32>
    tpu.vector_store %arg6[%c0_14, %c0_15, %c0_16], %29 {strides = array<i32>} : memref<1x8x128xf32, #tpu.memory_space<vmem>>, vector<1x8x128xf32>,
    return
  }
}

</mosaic_0001>

<bundles_post_ra>
// kernel: tpu_custom_call.1
= control target key start
LH: loop header
LB: loop body
LE: loop exit
PB: predicated region body
PF: predicated region fallthrough
CT: control target
= control target key end

     0   :  { %11 = vsyncpa [#allocation3], 0  ;;  %s712_s0 = inlined_call_operand.vmem [shape: s32[8,1], index: 0, kind: input, shape index: {}]   ;;  %s713_s1 = inlined_call_operand.hbm [shape: bf16[64,128], index: 1, kind: input, shape index: {}]   ;;  %s714_s2 = inlined_call_operand.hbm [shape: bf16[128,128], index: 2, kind: input, shape index: {}]   ;;  %s715_s3 = inlined_call_operand.vmem [shape: f32[1,128], index: 3, kind: input, shape index: {}]   ;;  %s716_s4 = inlined_call_operand.hbm [shape: bf16[128,128], index: 4, kind: input, shape index: {}]   ;;  %s717_s5 = inlined_call_operand.vmem [shape: f32[1,128], index: 5, kind: input, shape index: {}]   ;;  %s718_s6 = inlined_call_operand.hbm [shape: f32[1,8,128], index: 6, kind: output, shape index: {}]  }
   0x1   :  { %12 = vsyncpa [#allocation6], 0 }
   0x2   :  { %13 = vsyncpa [#allocation4], 0  ;;  %s620_s21 = smov [#allocation5]   ;;  %s621_s23 = smov [#allocation2]  }
   0x3   :  { %s33_s22 = sshll.u32 %s620_s21, 4  ;;  %s21_s24 = sshll.u32 %s621_s23, 4  ;;  %s34_s22 = int_to_ptr.vmem [resolvable:$true] %s33_s22  ;;  %s22_s24 = int_to_ptr.vmem [resolvable:$true] %s21_s24 }
   0x4   :  { %s542_s25 = scalar_lea.vmem %s34_s22, 1024  ;;  %p547_p1 = scmp.lt.s32.totalorder %s34_s22, %s34_s22 }
   0x5   :  { %p543_p0 = scmp.ne.s32.totalorder %s34_s22, %s542_s25  ;;  %p548_p2 = scmp.lt.s32.totalorder %s542_s25, %s542_s25 }
   0x7   :  { %p549_p3 = por %p548_p2, %p547_p1 }
   0x9   :  { %p550_p4 = pnand %p549_p3, %p543_p0 }
   0xb   :  { %553 = shalt.err (!%p550_p4)
}
   0xc   :  { %s622_s26 = smov 64   ;;  %s623_s27 = smov 4  }
   0xd   :  { %39 = dma.hbm_to_vmem [thread:$0]  %s714_s2, 1024, %s34_s22, [#allocation6], %s622_s26, %s622_s26, %s623_s27  }
   0xe   :  { %s562_s30 = scalar_lea.vmem %s22_s24, 512  ;;  %p567_p6 = scmp.lt.s32.totalorder %s22_s24, %s22_s24 }
   0xf   :  { %p563_p5 = scmp.ne.s32.totalorder %s22_s24, %s562_s30  ;;  %p568_p7 = scmp.lt.s32.totalorder %s562_s30, %s562_s30 }
  0x11   :  { %p569_p8 = por %p568_p7, %p567_p6 }
  0x13   :  { %p570_p9 = pnand %p569_p8, %p563_p5 }
  0x15   :  { %573 = shalt.err (!%p570_p9)
}
  0x16   :  { %27 = dma.hbm_to_vmem [thread:$0]  %s713_s1, 512, %s22_s24, [#allocation3], %s622_s26, %s622_s26, %s623_s27  }
  0x17   :  { %s624_s9 = smov [#allocation7]  }
  0x18   :  { %s47_s10 = sshll.u32 %s624_s9, 4  ;;  %s48_s10 = int_to_ptr.vmem [resolvable:$true] %s47_s10 }
  0x19   :  { %s582_s11 = scalar_lea.vmem %s48_s10, 1024  ;;  %p587_p11 = scmp.lt.s32.totalorder %s48_s10, %s48_s10 }
  0x1a   :  { %p583_p10 = scmp.ne.s32.totalorder %s48_s10, %s582_s11  ;;  %p588_p12 = scmp.lt.s32.totalorder %s582_s11, %s582_s11 }
  0x1c   :  { %p589_p13 = por %p588_p12, %p587_p11 }
  0x1e   :  { %p590_p0 = pnand %p589_p13, %p583_p10 }
  0x20   :  { %593 = shalt.err (!%p590_p0)
}
  0x21   :  { %53 = dma.hbm_to_vmem [thread:$0]  %s716_s4, 1024, %s48_s10, [#allocation6], %s622_s26, %s622_s26, %s623_s27  }
  0x22   :  { %614 = dma.done.wait [#allocation3], 512  }
  0x23   :  { %615 = vsyncadd [#allocation3], 4294966784 }
  0x24   :  { %616 = dma.done.wait [#allocation6], 2048  }
  0x25   :  { %617 = vsyncadd [#allocation6], 4294965248  ;;  %v625_v0 = vmov 0   ;;  %v626_v1 = vmov 0.0   ;;  %v66_v2 = vld [vmem:[%s712_s0] sm:$0xff]  ;;  %vm627_vm0 = vmmov 0   ;;  %v67_v14 = vlaneseq }
  0x26   :  { %509 = vset.pattern.permute.xlu0 %v625_v0  ;;  %448 = vmatprep.subr.bf16.mxu0 %v626_v1  ;;  %v510_v3 = vld [vmem:[#allocation2 + $0x18] sm:$0xff]   ;;  %v511_v4 = vld [vmem:[#allocation2 + $0x10] sm:$0xff]   ;;  %v512_v6 = vld [vmem:[#allocation2 + $0x8] sm:$0xff]   ;;  %vm108_vm2 = vcmask 523264   ;;  %s628_s16 = smov [#allocation8]  }
  0x27   :  { %460 = vmatprep.subr.bf16.mxu1 %v626_v1  ;;  %456 = vmatprep.mubr.msk.bf16.mxu0 %vm627_vm0, %v626_v1  ;;  %v514_v5 = vld [vmem:[#allocation5 + $0x38] sm:$0xff]   ;;  %v515_v7 = vld [vmem:[#allocation5 + $0x30] sm:$0xff]   ;;  %v513_v8 = vld [vmem:[#allocation2] sm:$0xff]   ;;  %v68_v15 = vand.u32 127, %v67_v14 }
  0x28   :  { %476 = vmatprep.mubr.msk.bf16.mxu1 %vm627_vm0, %v626_v1  ;;  %70 = vperm.xlu0 %509, %v66_v2   ;;  %v516_v9 = vld [vmem:[#allocation5 + $0x28] sm:$0xff]   ;;  %v517_v10 = vld [vmem:[#allocation5 + $0x20] sm:$0xff]   ;;  %v518_v11 = vld [vmem:[#allocation5 + $0x18] sm:$0xff]  }
  0x29   :  { %449 = vmatpush3.bf16.msra.mxu0 %v510_v3  ;;  %461 = vmatpush3.bf16.msra.mxu1 %v514_v5  ;;  %v519_v12 = vld [vmem:[#allocation5 + $0x10] sm:$0xff]   ;;  %v520_v13 = vld [vmem:[#allocation5 + $0x8] sm:$0xff]   ;;  %v521_v19 = vld [vmem:[#allocation5] sm:$0xff]  }
  0x2a   :  { %450 = vmatprep.subr.bf16.mxu0 %v626_v1  ;;  %462 = vmatprep.subr.bf16.mxu1 %v626_v1  ;;  %v522_v25 = vld [vmem:[#allocation7 + $0x38] sm:$0xff]   ;;  %v523_v26 = vld [vmem:[#allocation7 + $0x30] sm:$0xff]   ;;  %v524_v27 = vld [vmem:[#allocation7 + $0x28] sm:$0xff]  }
  0x2b   :  { %v525_v28 = vld [vmem:[#allocation7 + $0x20] sm:$0xff]   ;;  %v526_v29 = vld [vmem:[#allocation7 + $0x18] sm:$0xff]   ;;  %v527_v30 = vld [vmem:[#allocation7 + $0x10] sm:$0xff]  }
  0x2c   :  { %v528_v31 = vld [vmem:[#allocation7 + $0x8] sm:$0xff]   ;;  %v529_v32 = vld [vmem:[#allocation7] sm:$0xff]  }
  0x2d   :  { %451 = vmatpush3.bf16.msra.mxu0 %v511_v4  ;;  %463 = vmatpush3.bf16.msra.mxu1 %v515_v7  ;;  %v406_v33 = vld [vmem:[%s715_s3] ss:$0 sm:$0xff]  ;;  %s390_s3 = sshll.u32 %s628_s16, 4  ;;  %s391_s3 = int_to_ptr.vmem [resolvable:$true] %s390_s3 }
  0x2e   :  { %452 = vmatprep.subr.bf16.mxu0 %v626_v1  ;;  %464 = vmatprep.subr.bf16.mxu1 %v626_v1  ;;  %v416_v45 = vld [vmem:[%s717_s5] ss:$0 sm:$0xff]  ;;  %s594_s17 = scalar_lea.vmem %s391_s3, 128  ;;  %p599_p2 = scmp.lt.s32.totalorder %s391_s3, %s391_s3 }
  0x2f   :  { %p595_p1 = scmp.ne.s32.totalorder %s391_s3, %s594_s17  ;;  %p600_p3 = scmp.lt.s32.totalorder %s594_s17, %s594_s17 }
  0x31   :  { %453 = vmatpush3.bf16.msra.mxu0 %v512_v6  ;;  %465 = vmatpush3.bf16.msra.mxu1 %v516_v9  ;;  %p601_p4 = por %p600_p3, %p599_p2 }
  0x32   :  { %454 = vmatprep.subr.bf16.mxu0 %v626_v1  ;;  %466 = vmatprep.subr.bf16.mxu1 %v626_v1 }
  0x33   :  { %p602_p5 = pnand %p601_p4, %p595_p1 }
  0x35   :  { %455 = vmatpush3.bf16.msra.mxu0 %v513_v8  ;;  %467 = vmatpush3.bf16.msra.mxu1 %v517_v10 }
  0x36   :  { %480 = vmatprep.subr.bf16.mxu0 %v626_v1  ;;  %468 = vmatprep.subr.bf16.mxu1 %v626_v1 }
  0x39   :  { %469 = vmatpush3.bf16.msra.mxu1 %v518_v11 }
  0x3a   :  { %470 = vmatprep.subr.bf16.mxu1 %v626_v1 }
  0x3d   :  { %471 = vmatpush3.bf16.msra.mxu1 %v519_v12 }
  0x3e   :  { %472 = vmatprep.subr.bf16.mxu1 %v626_v1 }
  0x41   :  { %473 = vmatpush3.bf16.msra.mxu1 %v520_v13 }
  0x42   :  { %474 = vmatprep.subr.bf16.mxu1 %v626_v1 }
  0x45   :  { %475 = vmatpush3.bf16.msra.mxu1 %v521_v19 }
  0xa3   :  { %v71_v16 = vpop.permute.xlu0 %70 }
  0xa4   :  { %vm72_vm1 = vcmp.eq.s32.totalorder %v68_v15, %v71_v16 }
  0xa5   :  { %v400_v17 = vsel %vm72_vm1, 1.0, %v626_v1 }
  0xa6   :  { %v75_v18 = vpack.c.bf16 %v400_v17, %v400_v17 }
  0xa8   :  { %457 = vmatmul.mubr.msk.bf16.vlgmr.msra.gmra.mxu0 %vm108_vm2, %v75_v18 }
  0xa9   :  { %496 = vmatprep.mubr.msk.bf16.mxu0 %vm627_vm0, %v626_v1  ;;  %481 = vmatpush3.bf16.msra.mxu0 %v522_v25 }
  0xaa   :  { %482 = vmatprep.subr.bf16.mxu0 %v626_v1 }
  0xad   :  { %483 = vmatpush3.bf16.msra.mxu0 %v523_v26 }
  0xae   :  { %484 = vmatprep.subr.bf16.mxu0 %v626_v1 }
  0xb1   :  { %485 = vmatpush3.bf16.msra.mxu0 %v524_v27 }
  0xb2   :  { %486 = vmatprep.subr.bf16.mxu0 %v626_v1 }
  0xb5   :  { %487 = vmatpush3.bf16.msra.mxu0 %v525_v28 }
  0xb6   :  { %488 = vmatprep.subr.bf16.mxu0 %v626_v1 }
  0xb9   :  { %489 = vmatpush3.bf16.msra.mxu0 %v526_v29 }
  0xba   :  { %490 = vmatprep.subr.bf16.mxu0 %v626_v1 }
  0xbd   :  { %491 = vmatpush3.bf16.msra.mxu0 %v527_v30 }
  0xbe   :  { %492 = vmatprep.subr.bf16.mxu0 %v626_v1 }
  0xc1   :  { %493 = vmatpush3.bf16.msra.mxu0 %v528_v31 }
  0xc2   :  { %494 = vmatprep.subr.bf16.mxu0 %v626_v1 }
  0xc5   :  { %495 = vmatpush3.bf16.msra.mxu0 %v529_v32 }
 0x168   :  { %v146_v20 = vpop.f32.mrf.mxu0 }
 0x169   :  { %v152_v21 = vpack.c.bf16 %v146_v20, %v146_v20 }
 0x16a   :  { %v458_v22 = vpop.f32.mrf.mxu0 }
 0x16b   :  { %477 = vmatmul.mubr.bf16.vlgmr.msra.gmra.mxu1 %v152_v21 }
 0x16c   :  { %v149_v23 = vpop.f32.mrf.mxu0 }
 0x16e   :  { %v459_v24 = vpop.f32.mrf.mxu0 }
 0x22b   :  { %v258_v34 = vpop.f32.mrf.mxu1 }
 0x22c   :  { %v259_v35 = vadd.f32 %v406_v33, %v258_v34 }
 0x22d   :  { %v478_v36 = vpop.f32.mrf.mxu1 }
 0x22e   :  { %v415_v37 = vmul.f32 -1.442695, %v259_v35 }
 0x22f   :  { %v261_v38 = vpop.f32.mrf.mxu1 }
 0x230   :  { %530 = vpow2.f32 %v415_v37 }
 0x231   :  { %v479_v39 = vpop.f32.mrf.mxu1 }
 0x23d   :  { %v531_v40 = vpop.eup %530 }
 0x23e   :  { %v267_v41 = vadd.f32 1.0, %v531_v40 }
 0x240   :  { %532 = vrcp.f32 %v267_v41 }
 0x24d   :  { %v533_v42 = vpop.eup %532 }
 0x24e   :  { %v270_v43 = vmul.f32 %v533_v42, %v259_v35 }
 0x250   :  { %v271_v44 = vpack.c.bf16 %v270_v43, %v270_v43 }
 0x252   :  { %497 = vmatmul.mubr.bf16.vlgmr.msra.gmra.mxu0 %v271_v44 }
 0x312   :  { %v377_v46 = vpop.f32.mrf.mxu0 }
 0x313   :  { %v378_v47 = vadd.f32 %v416_v45, %v377_v46 }
 0x314   :  { %v498_v48 = vpop.f32.mrf.mxu0 }
 0x315   :  { %383 = vst [vmem:[#allocation8] sm:$0xff] %v378_v47 }
 0x316   :  { %v380_v49 = vpop.f32.mrf.mxu0 }
 0x317   :  { %605 = shalt.err (!%p602_p5)
}
 0x318   :  { %393 = dma.vmem_to_hbm [thread:$0]  %s391_s3, 128, %s718_s6, [#allocation4]   ;;  %v499_v50 = vpop.f32.mrf.mxu0 }
 0x319   :  { %618 = dma.done.wait [#allocation4], 128  }
 0x31a   :  { %619 = vsyncadd [#allocation4], 4294967168 }
 0x31b   :  { %397 = vsyncpa [#allocation3], 1 }
 0x31c   :  { %398 = vsyncpa [#allocation6], 1 }
 0x31d   :  { %399 = vsyncpa [#allocation4], 1 }

</bundles_post_ra>
